<compile_context>
chip_gen: v7x
topology: tpu7x:2x2x1
jax: 0.10.0
libtpu: 0.0.40
codegen_flags: <defaults>
</compile_context>

<pallas_src>
import jax
import jax.numpy as jnp
from jax.experimental import pallas as pl
from jax.experimental.pallas import tpu as pltpu

LANE = 128


def mlp_kernel(x_ref, w1_ref, b1_ref, w2_ref, b2_ref, w3_ref, b3_ref, o_ref):
    # fc1 + ReLU (f32 MXU matmul, f32 accumulation, VPU bias/ReLU).
    h1 = jnp.dot(x_ref[...], w1_ref[...], preferred_element_type=jnp.float32) + b1_ref[...]
    h1 = jnp.maximum(h1, 0.0)
    # Dropout(0.5): identity in eval/inference mode.
    # TODO(synk): training-mode stochastic dropout (pltpu.prng_seed + prng_random_bits mask
    # with 2x rescale per layer) not wired in; callers must not use this for training.
    # fc2 + ReLU (fc2 width zero-padded to 128 lanes in prepare_params -> full-lane dense).
    h2 = jnp.dot(h1, w2_ref[...], preferred_element_type=jnp.float32) + b2_ref[...]
    h2 = jnp.maximum(h2, 0.0)
    # fc3 (no activation). Output block is (tile_b, out_size) — small masked store, but the
    # HBM writeback is only the useful bytes (no 128-lane zero padding streamed to HBM).
    o_ref[...] = jnp.dot(h2, w3_ref[...], preferred_element_type=jnp.float32) + b3_ref[...]


def prepare_params(params):
    """One-time weight prep (hoisted out of the forward path).

    Zero-pads fc2's width (64 -> 128) so h2 and the fc3 contraction are full-lane dense:
    padded b2 columns are 0 and padded w2 columns are 0 => padded h2 columns are ReLU(0)=0,
    and the matching zero rows appended to w3 contribute nothing. Everything stays f32.
    """
    w1, b1, w2, b2, w3, b3 = params
    h1_size, h2_size = w2.shape
    out_size = w3.shape[1]
    h2_pad = pl.cdiv(h2_size, LANE) * LANE

    f32 = jnp.float32
    w1_p = w1.astype(f32)
    b1_p = b1.reshape(1, -1).astype(f32)
    w2_p = jnp.zeros((h1_size, h2_pad), f32).at[:, :h2_size].set(w2.astype(f32))
    b2_p = jnp.zeros((1, h2_pad), f32).at[:, :h2_size].set(b2.reshape(1, -1).astype(f32))
    w3_p = jnp.zeros((h2_pad, out_size), f32).at[:h2_size, :].set(w3.astype(f32))
    b3_p = b3.reshape(1, -1).astype(f32)
    return w1_p, b1_p, w2_p, b2_p, w3_p, b3_p


def chatbot_forward(x, prepared_params, *, tile_b=512):
    """x: (B, input_size) f32. prepared_params: output of prepare_params()."""
    w1, b1, w2, b2, w3, b3 = prepared_params
    B, in_size = x.shape
    h1_size = w1.shape[1]
    h2_pad = w2.shape[1]
    out_size = w3.shape[1]

    # Clamp tile to the (sublane-rounded) batch; keep it a multiple of 8.
    tile_b = max(8, min(tile_b, ((B + 7) // 8) * 8))
    assert tile_b % 8 == 0, "tile_b must be sublane-aligned (multiple of 8)"
    grid = (pl.cdiv(B, tile_b),)

    # Weights/biases: constant index_map -> resident in VMEM across grid steps.
    wspec = lambda shape: pl.BlockSpec(shape, lambda i: (0, 0))

    flops = 2 * B * (in_size * h1_size + h1_size * h2_pad + h2_pad * out_size)
    bytes_accessed = (
        x.size * x.dtype.itemsize
        + (w1.size + w2.size + w3.size + b1.size + b2.size + b3.size) * 4
        + B * out_size * 4
    )

    out = pl.pallas_call(
        mlp_kernel,
        out_shape=jax.ShapeDtypeStruct((B, out_size), jnp.float32),
        grid=grid,
        in_specs=[
            pl.BlockSpec((tile_b, in_size), lambda i: (i, 0)),   # x tile
            wspec((in_size, h1_size)),                           # w1
            wspec((1, h1_size)),                                 # b1
            wspec((h1_size, h2_pad)),                            # w2 (width padded to 128)
            wspec((1, h2_pad)),                                  # b2 (width padded to 128)
            wspec((h2_pad, out_size)),                           # w3 (zero rows appended)
            wspec((1, out_size)),                                # b3
        ],
        out_specs=pl.BlockSpec((tile_b, out_size), lambda i: (i, 0)),
        compiler_params=pltpu.CompilerParams(
            dimension_semantics=("parallel",),
        ),
        cost_estimate=pl.CostEstimate(
            flops=flops, transcendentals=0, bytes_accessed=bytes_accessed
        ),
    )(x, w1, b1, w2, b2, w3, b3)

    return out


def init_params(key, input_size, output_size):
    # Deterministic synthetic parameters (PyTorch-equivalent shapes, weights stored (in, out)).
    k1, k2, k3, k4, k5, k6 = jax.random.split(key, 6)
    w1 = jax.random.normal(k1, (input_size, 128), jnp.float32) * 0.05
    b1 = jax.random.normal(k2, (1, 128), jnp.float32) * 0.05
    w2 = jax.random.normal(k3, (128, 64), jnp.float32) * 0.05
    b2 = jax.random.normal(k4, (1, 64), jnp.float32) * 0.05
    w3 = jax.random.normal(k5, (64, output_size), jnp.float32) * 0.05
    b3 = jax.random.normal(k6, (1, output_size), jnp.float32) * 0.05
    return w1, b1, w2, b2, w3, b3


if __name__ == "__main__":
    input_size = 32
    output_size = 16
    batch = 256      # with tile_b=128 -> grid of 2 steps (keeps both v7x TCs busy)
    tile_b = 128

    key = jax.random.PRNGKey(0)
    kx, kp = jax.random.split(key)
    x = jax.random.normal(kx, (batch, input_size), jnp.float32)
    params = init_params(kp, input_size, output_size)

    # One-time weight prep (would be cached alongside the params in a real inference loop).
    prepared = prepare_params(params)

    out = chatbot_forward(x, prepared, tile_b=tile_b)
    jax.block_until_ready(out)
    assert out.shape == (batch, output_size)

    # Pure-f32 reference (kernel is now f32 end-to-end; tolerance covers MXU f32 pass rounding).
    w1, b1, w2, b2, w3, b3 = params
    ref = jnp.maximum(x @ w1 + b1, 0.0)
    ref = jnp.maximum(ref @ w2 + b2, 0.0)
    ref = ref @ w3 + b3
    assert jnp.allclose(out, ref, atol=2e-2, rtol=2e-2), "mismatch vs f32 reference"

    print("KERNEL_OK")
</pallas_src>

<mosaic_0001>
module attributes {stable_mosaic.version = 11 : i64} {
  func.func @mlp_kernel(%arg0: i32, %arg1: memref<128x32xf32, #tpu.memory_space<vmem>>, %arg2: memref<32x128xf32, #tpu.memory_space<vmem>>, %arg3: memref<1x128xf32, #tpu.memory_space<vmem>>, %arg4: memref<128x128xf32, #tpu.memory_space<vmem>>, %arg5: memref<1x128xf32, #tpu.memory_space<vmem>>, %arg6: memref<128x16xf32, #tpu.memory_space<vmem>>, %arg7: memref<1x16xf32, #tpu.memory_space<vmem>>, %arg8: memref<128x16xf32, #tpu.memory_space<vmem>>) attributes {dimension_semantics = [#tpu.dimension_semantics<parallel>], iteration_bounds = array<i64: 2>, scalar_prefetch = 0 : i64, scratch_operands = 0 : i64, tpu.core_type = #tpu.core_type<tc>, window_params = [{transform_indices = @transform_0, window_bounds = array<i64: 128, 32>}, {pipeline_mode = #tpu.pipeline_mode<synchronous>, transform_indices = @transform_1, window_bounds = array<i64: 32, 128>}, {pipeline_mode = #tpu.pipeline_mode<synchronous>, transform_indices = @transform_2, window_bounds = array<i64: 1, 128>}, {pipeline_mode = #tpu.pipeline_mode<synchronous>, transform_indices = @transform_3, window_bounds = array<i64: 128, 128>}, {pipeline_mode = #tpu.pipeline_mode<synchronous>, transform_indices = @transform_4, window_bounds = array<i64: 1, 128>}, {pipeline_mode = #tpu.pipeline_mode<synchronous>, transform_indices = @transform_5, window_bounds = array<i64: 128, 16>}, {pipeline_mode = #tpu.pipeline_mode<synchronous>, transform_indices = @transform_6, window_bounds = array<i64: 1, 16>}, {transform_indices = @transform_7, window_bounds = array<i64: 128, 16>}]} {
    %c0 = arith.constant 0 : index
    %c0_0 = arith.constant 0 : index
    %0 = vector.load %arg1[%c0, %c0_0] : memref<128x32xf32, #tpu.memory_space<vmem>>, vector<128x32xf32>
    %c0_1 = arith.constant 0 : index
    %c0_2 = arith.constant 0 : index
    %1 = vector.load %arg2[%c0_1, %c0_2] : memref<32x128xf32, #tpu.memory_space<vmem>>, vector<32x128xf32>
    %cst = arith.constant dense<0.000000e+00> : vector<128x128xf32>
    %2 = tpu.matmul %0, %1, %cst {dimension_numbers = #tpu.dot_dimension_numbers<[1], [0], [0], [1], [0, 0, 1, 1], [], []>} : vector<128x32xf32>, vector<32x128xf32>, vector<128x128xf32> -> vector<128x128xf32>
    %c0_3 = arith.constant 0 : index
    %c0_4 = arith.constant 0 : index
    %3 = vector.load %arg3[%c0_3, %c0_4] : memref<1x128xf32, #tpu.memory_space<vmem>>, vector<1x128xf32>
    %4 = vector.broadcast %3 : vector<1x128xf32> to vector<128x128xf32>
    %5 = arith.addf %2, %4 : vector<128x128xf32>
    %cst_5 = arith.constant 0.000000e+00 : f32
    %6 = vector.broadcast %cst_5 : f32 to vector<128x128xf32>
    %7 = arith.maximumf %5, %6 : vector<128x128xf32>
    %c0_6 = arith.constant 0 : index
    %c0_7 = arith.constant 0 : index
    %8 = vector.load %arg4[%c0_6, %c0_7] : memref<128x128xf32, #tpu.memory_space<vmem>>, vector<128x128xf32>
    %cst_8 = arith.constant dense<0.000000e+00> : vector<128x128xf32>
    %9 = tpu.matmul %7, %8, %cst_8 {dimension_numbers = #tpu.dot_dimension_numbers<[1], [0], [0], [1], [0, 0, 1, 1], [], []>} : vector<128x128xf32>, vector<128x128xf32>, vector<128x128xf32> -> vector<128x128xf32>
    %c0_9 = arith.constant 0 : index
    %c0_10 = arith.constant 0 : index
    %10 = vector.load %arg5[%c0_9, %c0_10] : memref<1x128xf32, #tpu.memory_space<vmem>>, vector<1x128xf32>
    %11 = vector.broadcast %10 : vector<1x128xf32> to vector<128x128xf32>
    %12 = arith.addf %9, %11 : vector<128x128xf32>
    %cst_11 = arith.constant 0.000000e+00 : f32
    %13 = vector.broadcast %cst_11 : f32 to vector<128x128xf32>
    %14 = arith.maximumf %12, %13 : vector<128x128xf32>
    %c0_12 = arith.constant 0 : index
    %c0_13 = arith.constant 0 : index
    %15 = vector.load %arg6[%c0_12, %c0_13] : memref<128x16xf32, #tpu.memory_space<vmem>>, vector<128x16xf32>
    %cst_14 = arith.constant dense<0.000000e+00> : vector<128x16xf32>
    %16 = tpu.matmul %14, %15, %cst_14 {dimension_numbers = #tpu.dot_dimension_numbers<[1], [0], [0], [1], [0, 0, 1, 1], [], []>} : vector<128x128xf32>, vector<128x16xf32>, vector<128x16xf32> -> vector<128x16xf32>
    %c0_15 = arith.constant 0 : index
    %c0_16 = arith.constant 0 : index
    %17 = vector.load %arg7[%c0_15, %c0_16] : memref<1x16xf32, #tpu.memory_space<vmem>>, vector<1x16xf32>
    %18 = vector.broadcast %17 : vector<1x16xf32> to vector<128x16xf32>
    %19 = arith.addf %16, %18 : vector<128x16xf32>
    %c0_17 = arith.constant 0 : index
    %c0_18 = arith.constant 0 : index
    %20 = vector.load %arg8[%c0_17, %c0_18] : memref<128x16xf32, #tpu.memory_space<vmem>>, vector<128x16xf32>
    tpu.vector_store %arg8[%c0_17, %c0_18], %19 {strides = array<i32>} : memref<128x16xf32, #tpu.memory_space<vmem>>, vector<128x16xf32>,
    return
  }
  func.func @transform_0(%arg0: i32) -> (i32, i32) {
    %c0_i32 = arith.constant 0 : i32
    %c0_i32_0 = arith.constant 0 : i32
    return %arg0, %c0_i32 : i32, i32
  }
  func.func @transform_1(%arg0: i32) -> (i32, i32) {
    %c0_i32 = arith.constant 0 : i32
    %c0_i32_0 = arith.constant 0 : i32
    %c0_i32_1 = arith.constant 0 : i32
    return %c0_i32, %c0_i32_0 : i32, i32
  }
  func.func @transform_2(%arg0: i32) -> (i32, i32) {
    %c0_i32 = arith.constant 0 : i32
    %c0_i32_0 = arith.constant 0 : i32
    %c0_i32_1 = arith.constant 0 : i32
    return %c0_i32, %c0_i32_0 : i32, i32
  }
  func.func @transform_3(%arg0: i32) -> (i32, i32) {
    %c0_i32 = arith.constant 0 : i32
    %c0_i32_0 = arith.constant 0 : i32
    %c0_i32_1 = arith.constant 0 : i32
    return %c0_i32, %c0_i32_0 : i32, i32
  }
  func.func @transform_4(%arg0: i32) -> (i32, i32) {
    %c0_i32 = arith.constant 0 : i32
    %c0_i32_0 = arith.constant 0 : i32
    %c0_i32_1 = arith.constant 0 : i32
    return %c0_i32, %c0_i32_0 : i32, i32
  }
  func.func @transform_5(%arg0: i32) -> (i32, i32) {
    %c0_i32 = arith.constant 0 : i32
    %c0_i32_0 = arith.constant 0 : i32
    %c0_i32_1 = arith.constant 0 : i32
    return %c0_i32, %c0_i32_0 : i32, i32
  }
  func.func @transform_6(%arg0: i32) -> (i32, i32) {
    %c0_i32 = arith.constant 0 : i32
    %c0_i32_0 = arith.constant 0 : i32
    %c0_i32_1 = arith.constant 0 : i32
    return %c0_i32, %c0_i32_0 : i32, i32
  }
  func.func @transform_7(%arg0: i32) -> (i32, i32) {
    %c0_i32 = arith.constant 0 : i32
    %c0_i32_0 = arith.constant 0 : i32
    return %arg0, %c0_i32 : i32, i32
  }
}

</mosaic_0001>

<bundles_post_ra>
// kernel: tpu_custom_call.1
= control target key start
LH: loop header
LB: loop body
LE: loop exit
PB: predicated region body
PF: predicated region fallthrough
CT: control target
= control target key end

     0   :  { %s1346_s24 = smov 0   ;;  %s1597_s0 = inlined_call_operand.vmem [shape: f32[256,32], index: 0, kind: input, shape index: {}]   ;;  %s1598_s1 = inlined_call_operand.vmem [shape: f32[32,128], index: 1, kind: input, shape index: {}]   ;;  %s1599_s2 = inlined_call_operand.vmem [shape: f32[1,128], index: 2, kind: input, shape index: {}]   ;;  %s1600_s3 = inlined_call_operand.vmem [shape: f32[128,128], index: 3, kind: input, shape index: {}]   ;;  %s1601_s4 = inlined_call_operand.vmem [shape: f32[1,128], index: 4, kind: input, shape index: {}]   ;;  %s1602_s5 = inlined_call_operand.vmem [shape: f32[128,16], index: 5, kind: input, shape index: {}]   ;;  %s1603_s6 = inlined_call_operand.vmem [shape: f32[1,16], index: 6, kind: input, shape index: {}]   ;;  %s1604_s7 = inlined_call_operand.vmem [shape: f32[256,16], index: 7, kind: output, shape index: {}]  }
   0x1 LB: > { %s944_s25 = sadd.s32 4294967295, %s1304_s24   ;;  %p948_p0 = scmp.ge.s32.totalorder %s1304_s24, 1  ;;  %s1304_s24 = sphi %s1346_s24, %s17_s24  }
   0x2   : > { %p238_p1 = scmp.lt.s32.totalorder %s1304_s24, 3 }
   0x4   : > { %p239_p2 = pnand %p948_p0, %p238_p1 }
   0x5   : > { %v298_v0 = vld [vmem:[%s1598_s1] sm:$0xff] (!%p239_p2)  ;;  %v299_v1 = vld [vmem:[%s1598_s1 + $0x8] sm:$0xff] (!%p239_p2)  ;;  %v300_v2 = vld [vmem:[%s1598_s1 + $0x10] sm:$0xff] (!%p239_p2)  ;;  %s949_s9 = sshll.u32 (!%p239_p2), %s944_s25, 4  ;;  %vm309_vm0 = vcmask (!%p239_p2), 261120   ;;  %vm871_vm1 = vcmask (!%p239_p2), 130048  }
   0x6   : > { %242 = sbr.rel (%p239_p2) target bundleno = 698 (0x2ba), region = 48  ;;  %v1202_v3 = vpack.c.bf16 (!%p239_p2), %v299_v1, %v298_v0  ;;  %v301_v4 = vld [vmem:[%s1598_s1 + $0x18] sm:$0xff] (!%p239_p2)  ;;  %p271_p3 = scmp.lt.s32.totalorder (!%p239_p2), %s949_s9, 31  ;;  %v519_v5 = vld [vmem:[%s1600_s3] sm:$0xff] (!%p239_p2)  ;;  %v520_v6 = vld [vmem:[%s1600_s3 + $0x8] sm:$0xff] (!%p239_p2) }
   0x7   : > { %v1206_v7 = vpack.c.bf16 (!%p239_p2), %v301_v4, %v300_v2  ;;  %v1210_v8 = vpack.c.bf16 (!%p239_p2), %v520_v6, %v519_v5  ;;  %v521_v9 = vld [vmem:[%s1600_s3 + $0x10] sm:$0xff] (!%p239_p2)  ;;  %v522_v10 = vld [vmem:[%s1600_s3 + $0x18] sm:$0xff] (!%p239_p2)  ;;  %v523_v12 = vld [vmem:[%s1600_s3 + $0x20] sm:$0xff] (!%p239_p2) }
   0x8   : > { %1203 = vmatprep.subr.bf16.mxu0 (!%p239_p2), %v1202_v3  ;;  %v1214_v11 = vpack.c.bf16 (!%p239_p2), %v522_v10, %v521_v9  ;;  %v524_v13 = vld [vmem:[%s1600_s3 + $0x28] sm:$0xff] (!%p239_p2)  ;;  %v525_v16 = vld [vmem:[%s1600_s3 + $0x30] sm:$0xff] (!%p239_p2)  ;;  %v526_v17 = vld [vmem:[%s1600_s3 + $0x38] sm:$0xff] (!%p239_p2) }
   0x9   : > { %1205 = vmatpush3.bf16.msra.mxu0 (!%p239_p2), %v1202_v3  ;;  %1211 = vmatprep.subr.bf16.mxu1 (!%p239_p2), %v1210_v8  ;;  %v1218_v14 = vpack.c.bf16 (!%p239_p2), %v524_v13, %v523_v12  ;;  %v1222_v20 = vpack.c.bf16 (!%p239_p2), %v526_v17, %v525_v16  ;;  %v527_v21 = vld [vmem:[%s1600_s3 + $0x40] sm:$0xff] (!%p239_p2)  ;;  %v528_v22 = vld [vmem:[%s1600_s3 + $0x48] sm:$0xff] (!%p239_p2)  ;;  %v529_v26 = vld [vmem:[%s1600_s3 + $0x50] sm:$0xff] (!%p239_p2) }
   0xa   : > { %1207 = vmatprep.subr.bf16.mxu0 (!%p239_p2), %v1206_v7  ;;  %1213 = vmatpush3.bf16.msra.mxu1 (!%p239_p2), %v1210_v8  ;;  %v1226_v25 = vpack.c.bf16 (!%p239_p2), %v528_v22, %v527_v21  ;;  %v530_v27 = vld [vmem:[%s1600_s3 + $0x58] sm:$0xff] (!%p239_p2)  ;;  %v531_v31 = vld [vmem:[%s1600_s3 + $0x60] sm:$0xff] (!%p239_p2)  ;;  %v532_v32 = vld [vmem:[%s1600_s3 + $0x68] sm:$0xff] (!%p239_p2) }
   0xb   : > { %1215 = vmatprep.subr.bf16.mxu1 (!%p239_p2), %v1214_v11  ;;  %v1230_v30 = vpack.c.bf16 (!%p239_p2), %v530_v27, %v529_v26  ;;  %v1234_v35 = vpack.c.bf16 (!%p239_p2), %v532_v32, %v531_v31  ;;  %v533_v43 = vld [vmem:[%s1600_s3 + $0x70] sm:$0xff] (!%p239_p2)  ;;  %v534_v44 = vld [vmem:[%s1600_s3 + $0x78] sm:$0xff] (!%p239_p2)  ;;  %v703_v46 = vld [vmem:[%s1602_s5] sm:$0xff] (!%p239_p2) }
   0xc   : > { %v1238_v45 = vpack.c.bf16 (!%p239_p2), %v534_v44, %v533_v43  ;;  %v704_v47 = vld [vmem:[%s1602_s5 + $0x8] sm:$0xff] (!%p239_p2)  ;;  %v705_v48 = vld [vmem:[%s1602_s5 + $0x10] sm:$0xff] (!%p239_p2)  ;;  %v706_v50 = vld [vmem:[%s1602_s5 + $0x18] sm:$0xff] (!%p239_p2) }
   0xd   : > { %s1606_s9 = smov (!%p271_p3, %s949_s9), 31  ;;  %1209 = vmatpush3.bf16.msra.mxu0 %v1206_v7  ;;  %v1242_v49 = vpack.c.bf16 %v704_v47, %v703_v46  ;;  %v1246_v51 = vpack.c.bf16 %v706_v50, %v705_v48  ;;  %v707_v52 = vld [vmem:[%s1602_s5 + $0x20] sm:$0xff]  ;;  %v708_v53 = vld [vmem:[%s1602_s5 + $0x28] sm:$0xff]  ;;  %v709_v55 = vld [vmem:[%s1602_s5 + $0x30] sm:$0xff] }
   0xe   : > { %s950_s25 = sshll.u32 %s1606_s9, 3  ;;  %1217 = vmatpush3.bf16.msra.mxu1 %v1214_v11  ;;  %v1250_v54 = vpack.c.bf16 %v708_v53, %v707_v52  ;;  %v710_v56 = vld [vmem:[%s1602_s5 + $0x38] sm:$0xff]  ;;  %v711_v58 = vld [vmem:[%s1602_s5 + $0x40] sm:$0xff]  ;;  %v712_v59 = vld [vmem:[%s1602_s5 + $0x48] sm:$0xff] }
   0xf   : > { %s1392_s28 = scalar_lea.vmem %s1597_s0, %s950_s25  ;;  %1219 = vmatprep.subr.bf16.mxu1 %v1218_v14  ;;  %1243 = vmatprep.subr.bf16.mxu0 %v1242_v49  ;;  %v1480_v57 = vpack.c.bf16 %v710_v56, %v709_v55  ;;  %v1489_v60 = vpack.c.bf16 %v712_v59, %v711_v58  ;;  %v713_v61 = vld [vmem:[%s1602_s5 + $0x50] sm:$0xff]  ;;  %v714_v62 = vld [vmem:[%s1602_s5 + $0x58] sm:$0xff]  ;;  %v715_v0 = vld [vmem:[%s1602_s5 + $0x60] sm:$0xff]  ;;  %s1560_s30 = scalar_lea.vmem %s1604_s7, %s950_s25 }
  0x10   : > { %v282_v15 = vld [vmem:[%s1392_s28] sm:$0xff]  ;;  %v283_v18 = vld [vmem:[%s1392_s28 + $0x8] sm:$0xff]  ;;  %v284_v19 = vld [vmem:[%s1392_s28 + $0x10] sm:$0xff]  ;;  %v1499_v63 = vpack.c.bf16 %v714_v62, %v713_v61 }
  0x11   : > { %1066 = vmatprep.mubr.msk.f32.mxu0 %vm309_vm0, %v282_v15  ;;  %v285_v23 = vld [vmem:[%s1392_s28 + $0x18] sm:$0xff]  ;;  %v286_v24 = vld [vmem:[%s1392_s28 + $0x20] sm:$0xff]  ;;  %v287_v28 = vld [vmem:[%s1392_s28 + $0x28] sm:$0xff] }
  0x12   : > { %1067 = vmatmul.mubr.msk.f32.vlgmr.msra.gmra.mrb[0].mxu0 %vm309_vm0, %v283_v18  ;;  %1221 = vmatpush3.bf16.msra.mxu1 %v1218_v14  ;;  %v288_v29 = vld [vmem:[%s1392_s28 + $0x30] sm:$0xff]  ;;  %v289_v33 = vld [vmem:[%s1392_s28 + $0x38] sm:$0xff]  ;;  %v290_v34 = vld [vmem:[%s1392_s28 + $0x40] sm:$0xff] }
  0x13   : > { %1069 = vmatprep.mubr.msk.f32.mxu0 %vm309_vm0, %v284_v19  ;;  %1223 = vmatprep.subr.bf16.mxu1 %v1222_v20  ;;  %v291_v36 = vld [vmem:[%s1392_s28 + $0x48] sm:$0xff]  ;;  %v292_v37 = vld [vmem:[%s1392_s28 + $0x50] sm:$0xff]  ;;  %v293_v38 = vld [vmem:[%s1392_s28 + $0x58] sm:$0xff] }
  0x14   : > { %v294_v39 = vld [vmem:[%s1392_s28 + $0x60] sm:$0xff]  ;;  %v295_v40 = vld [vmem:[%s1392_s28 + $0x68] sm:$0xff]  ;;  %v296_v41 = vld [vmem:[%s1392_s28 + $0x70] sm:$0xff]  ;;  %1245 = vmatpush3.bf16.msra.mxu0 %v1242_v49 }
  0x15   : > { %v297_v42 = vld [vmem:[%s1392_s28 + $0x78] sm:$0xff]  ;;  %1247 = vmatprep.subr.bf16.mxu0 %v1246_v51  ;;  %v716_v1 = vld [vmem:[%s1602_s5 + $0x68] sm:$0xff]  ;;  %v1517_v3 = vld [vmem:[%s1599_s2] ss:$0 sm:$0xff] }
  0x16   : > { %1070 = vmatmul.mubr.msk.f32.gmra.mrb[2].mxu0 %vm309_vm0, %v285_v23  ;;  %1225 = vmatpush3.bf16.msra.mxu1 %v1222_v20  ;;  %v1509_v2 = vpack.c.bf16 %v716_v1, %v715_v0  ;;  %v717_v52 = vld [vmem:[%s1602_s5 + $0x70] sm:$0xff]  ;;  %v718_v53 = vld [vmem:[%s1602_s5 + $0x78] sm:$0xff]  ;;  %v970_v55 = vld [vmem:[%s1601_s4] ss:$0 sm:$0xff] }
  0x17   : > { %1072 = vmatprep.mubr.msk.f32.mxu0 %vm309_vm0, %v286_v24  ;;  %1227 = vmatprep.subr.bf16.mxu1 %v1226_v25 }
  0x18   : > { %1249 = vmatpush3.bf16.msra.mxu0 %v1246_v51 }
  0x19   : > { %1251 = vmatprep.subr.bf16.mxu0 %v1250_v54 }
  0x1a   : > { %1073 = vmatmul.mubr.msk.f32.gmra.mrb[4].mxu0 %vm309_vm0, %v287_v28  ;;  %1229 = vmatpush3.bf16.msra.mxu1 %v1226_v25 }
  0x1b   : > { %1075 = vmatprep.mubr.msk.f32.mxu0 %vm309_vm0, %v288_v29  ;;  %1231 = vmatprep.subr.bf16.mxu1 %v1230_v30 }
  0x1c   : > { %1253 = vmatpush3.bf16.msra.mxu0 %v1250_v54 }
  0x1d   : > { %1255 = vmatprep.subr.bf16.mxu0 %v1480_v57 }
  0x1e   : > { %1076 = vmatmul.mubr.msk.f32.gmra.mrb[6].mxu0 %vm309_vm0, %v289_v33  ;;  %1233 = vmatpush3.bf16.msra.mxu1 %v1230_v30 }
  0x1f   : > { %1078 = vmatprep.mubr.msk.f32.mxu0 %vm309_vm0, %v290_v34  ;;  %1235 = vmatprep.subr.bf16.mxu1 %v1234_v35 }
  0x20   : > { %1257 = vmatpush3.bf16.msra.mxu0 %v1480_v57 }
  0x21   : > { %1259 = vmatprep.subr.bf16.mxu0 %v1489_v60 }
  0x22   : > { %1079 = vmatmul.mubr.msk.f32.gmra.mrb[8].mxu0 %vm309_vm0, %v291_v36  ;;  %1237 = vmatpush3.bf16.msra.mxu1 %v1234_v35 }
  0x23   : > { %1081 = vmatprep.mubr.msk.f32.mxu0 %vm309_vm0, %v292_v37  ;;  %1239 = vmatprep.subr.bf16.mxu1 %v1238_v45 }
  0x24   : > { %1261 = vmatpush3.bf16.msra.mxu0 %v1489_v60 }
  0x25   : > { %1263 = vmatprep.subr.bf16.mxu0 %v1499_v63 }
  0x26   : > { %1082 = vmatmul.mubr.msk.f32.gmra.mrb[10].mxu0 %vm309_vm0, %v293_v38  ;;  %1241 = vmatpush3.bf16.msra.mxu1 %v1238_v45 }
  0x27   : > { %1084 = vmatprep.mubr.msk.f32.mxu0 %vm309_vm0, %v294_v39  ;;  %1274 = vmatprep.subr.bf16.mxu1 %v1242_v49 }
  0x28   : > { %1265 = vmatpush3.bf16.msra.mxu0 %v1499_v63 }
  0x29   : > { %1267 = vmatprep.subr.bf16.mxu0 %v1509_v2 }
  0x2a   : > { %1085 = vmatmul.mubr.msk.f32.gmra.mrb[12].mxu0 %vm309_vm0, %v295_v40 }
  0x2b   : > { %1087 = vmatprep.mubr.msk.f32.mxu0 %vm309_vm0, %v296_v41 }
  0x2c   : > { %1269 = vmatpush3.bf16.msra.mxu0 %v1509_v2 }
  0x2e   : > { %1088 = vmatmul.mubr.msk.f32.gmra.mrb[14].mxu0 %vm309_vm0, %v297_v42 }
  0xe5   : > { %v1068_v4 = vpop.f32.mrb[0].mxu0 }
  0xe6   : > { %v430_v5 = vadd.f32 %v1068_v4, %v1517_v3  ;;  %v424_v6 = vpop.f32.mrb[1].mxu0 }
  0xe7   : > { %v425_v7 = vadd.f32 %v1517_v3, %v424_v6 }
  0xe8   : > { %v504_v10 = vmax.f32 %v430_v5, 0.0 }
  0xe9   : > { %v1071_v8 = vpop.f32.mrb[2].mxu0  ;;  %v503_v9 = vmax.f32 %v425_v7, 0.0 }
  0xea   : > { %v440_v11 = vadd.f32 %v1071_v8, %v1517_v3  ;;  %v434_v12 = vpop.f32.mrb[3].mxu0 }
  0xeb   : > { %v435_v13 = vadd.f32 %v1517_v3, %v434_v12  ;;  %1122 = vmatprep.mubr.f32.mxu1 %v503_v9 }
  0xec   : > { %1123 = vmatmul.mubr.f32.vlgmr.msra.gmra.mrb[0].mxu1 %v504_v10  ;;  %v506_v16 = vmax.f32 %v440_v11, 0.0 }
  0xed   : > { %v505_v14 = vmax.f32 %v435_v13, 0.0  ;;  %v1074_v15 = vpop.f32.mrb[4].mxu0  ;;  %1282 = vmatpush3.bf16.msra.mxu1 %v1242_v49 }
  0xee   : > { %v450_v17 = vadd.f32 %v1074_v15, %v1517_v3  ;;  %v444_v18 = vpop.f32.mrb[5].mxu0  ;;  %1275 = vmatprep.subr.bf16.mxu1 %v1246_v51 }
  0xef   : > { %v445_v19 = vadd.f32 %v1517_v3, %v444_v18  ;;  %1125 = vmatprep.mubr.f32.mxu1 %v505_v14 }
  0xf0   : > { %1126 = vmatmul.mubr.f32.gmra.mrb[2].mxu1 %v506_v16  ;;  %v508_v22 = vmax.f32 %v450_v17, 0.0 }
  0xf1   : > { %v507_v20 = vmax.f32 %v445_v19, 0.0  ;;  %v1077_v21 = vpop.f32.mrb[6].mxu0  ;;  %1283 = vmatpush3.bf16.msra.mxu1 %v1246_v51 }
  0xf2   : > { %v460_v23 = vadd.f32 %v1077_v21, %v1517_v3  ;;  %v454_v24 = vpop.f32.mrb[7].mxu0  ;;  %1276 = vmatprep.subr.bf16.mxu1 %v1250_v54 }
  0xf3   : > { %v455_v25 = vadd.f32 %v1517_v3, %v454_v24  ;;  %1128 = vmatprep.mubr.f32.mxu1 %v507_v20 }
  0xf4   : > { %1129 = vmatmul.mubr.f32.gmra.mrb[4].mxu1 %v508_v22  ;;  %v510_v28 = vmax.f32 %v460_v23, 0.0 }
  0xf5   : > { %v509_v26 = vmax.f32 %v455_v25, 0.0  ;;  %v1080_v27 = vpop.f32.mrb[8].mxu0  ;;  %1284 = vmatpush3.bf16.msra.mxu1 %v1250_v54  ;;  %v1270_v54 = vpack.c.bf16 %v718_v53, %v717_v52 }
  0xf6   : > { %v470_v29 = vadd.f32 %v1080_v27, %v1517_v3  ;;  %v464_v30 = vpop.f32.mrb[9].mxu0  ;;  %1277 = vmatprep.subr.bf16.mxu1 %v1480_v57 }
  0xf7   : > { %v465_v31 = vadd.f32 %v1517_v3, %v464_v30  ;;  %1131 = vmatprep.mubr.f32.mxu1 %v509_v26  ;;  %1271 = vmatprep.subr.bf16.mxu0 %v1270_v54 }
  0xf8   : > { %1132 = vmatmul.mubr.f32.gmra.mrb[6].mxu1 %v510_v28  ;;  %v512_v34 = vmax.f32 %v470_v29, 0.0  ;;  %1273 = vmatpush3.bf16.msra.mxu0 %v1270_v54 }
  0xf9   : > { %v511_v32 = vmax.f32 %v465_v31, 0.0  ;;  %v1083_v33 = vpop.f32.mrb[10].mxu0  ;;  %1285 = vmatpush3.bf16.msra.mxu1 %v1480_v57 }
  0xfa   : > { %v480_v35 = vadd.f32 %v1083_v33, %v1517_v3  ;;  %v474_v36 = vpop.f32.mrb[11].mxu0  ;;  %1278 = vmatprep.subr.bf16.mxu1 %v1489_v60 }
  0xfb   : > { %v475_v37 = vadd.f32 %v1517_v3, %v474_v36  ;;  %1134 = vmatprep.mubr.f32.mxu1 %v511_v32 }
  0xfc   : > { %1135 = vmatmul.mubr.f32.gmra.mrb[8].mxu1 %v512_v34  ;;  %v514_v40 = vmax.f32 %v480_v35, 0.0 }
  0xfd   : > { %v513_v38 = vmax.f32 %v475_v37, 0.0  ;;  %v1086_v39 = vpop.f32.mrb[12].mxu0  ;;  %1286 = vmatpush3.bf16.msra.mxu1 %v1489_v60 }
  0xfe   : > { %v490_v41 = vadd.f32 %v1086_v39, %v1517_v3  ;;  %v484_v42 = vpop.f32.mrb[13].mxu0  ;;  %1279 = vmatprep.subr.bf16.mxu1 %v1499_v63 }
  0xff   : > { %v485_v43 = vadd.f32 %v1517_v3, %v484_v42  ;;  %1137 = vmatprep.mubr.f32.mxu1 %v513_v38 }
 0x100   : > { %1138 = vmatmul.mubr.f32.gmra.mrb[10].mxu1 %v514_v40  ;;  %v516_v46 = vmax.f32 %v490_v41, 0.0  ;;  %v971_v40 = vld [vmem:[%s1603_s6] ss:$0 sm:$0xff] }
 0x101   : > { %v515_v44 = vmax.f32 %v485_v43, 0.0  ;;  %v1089_v45 = vpop.f32.mrb[14].mxu0  ;;  %1287 = vmatpush3.bf16.msra.mxu1 %v1499_v63 }
 0x102   : > { %v500_v47 = vadd.f32 %v1089_v45, %v1517_v3  ;;  %v494_v48 = vpop.f32.mrb[15].mxu0  ;;  %1280 = vmatprep.subr.bf16.mxu1 %v1509_v2 }
 0x103   : > { %v495_v49 = vadd.f32 %v1517_v3, %v494_v48  ;;  %1140 = vmatprep.mubr.f32.mxu1 %v515_v44 }
 0x104   : > { %1141 = vmatmul.mubr.f32.gmra.mrb[12].mxu1 %v516_v46  ;;  %v518_v51 = vmax.f32 %v500_v47, 0.0 }
 0x105   : > { %v517_v50 = vmax.f32 %v495_v49, 0.0  ;;  %1288 = vmatpush3.bf16.msra.mxu1 %v1509_v2 }
 0x106   : > { %1281 = vmatprep.subr.bf16.mxu1 %v1270_v54 }
 0x107   : > { %1143 = vmatprep.mubr.f32.mxu1 %v517_v50 }
 0x108   : > { %1144 = vmatmul.mubr.f32.gmra.mrb[14].mxu1 %v518_v51 }
 0x109   : > { %1289 = vmatpush3.bf16.msra.mxu1 %v1270_v54 }
 0x1bf   : > { %v1124_v56 = vpop.f32.mrb[0].mxu1 }
 0x1c0   : > { %v614_v57 = vadd.f32 %v1124_v56, %v970_v55  ;;  %v608_v58 = vpop.f32.mrb[1].mxu1 }
 0x1c1   : > { %v609_v59 = vadd.f32 %v970_v55, %v608_v58 }
 0x1c2   : > { %v688_v62 = vmax.f32 %v614_v57, 0.0 }
 0x1c3   : > { %v687_v60 = vmax.f32 %v609_v59, 0.0  ;;  %v1127_v61 = vpop.f32.mrb[2].mxu1 }
 0x1c4   : > { %v624_v63 = vadd.f32 %v1127_v61, %v970_v55  ;;  %v618_v0 = vpop.f32.mrb[3].mxu1 }
 0x1c5   : > { %v619_v1 = vadd.f32 %v970_v55, %v618_v0  ;;  %1178 = vmatprep.mubr.f32.mxu0 %v687_v60 }
 0x1c6   : > { %1179 = vmatmul.mubr.f32.vlgmr.msra.gmra.mrb[16].mxu0 %v688_v62  ;;  %v690_v4 = vmax.f32 %v624_v63, 0.0 }
 0x1c7   : > { %v689_v2 = vmax.f32 %v619_v1, 0.0  ;;  %v1130_v3 = vpop.f32.mrb[4].mxu1 }
 0x1c8   : > { %v634_v5 = vadd.f32 %v1130_v3, %v970_v55  ;;  %v628_v6 = vpop.f32.mrb[5].mxu1 }
 0x1c9   : > { %v629_v7 = vadd.f32 %v970_v55, %v628_v6  ;;  %1181 = vmatprep.mubr.f32.mxu0 %v689_v2 }
 0x1ca   : > { %1182 = vmatmul.mubr.f32.gmra.mrb[18].mxu0 %v690_v4  ;;  %v692_v10 = vmax.f32 %v634_v5, 0.0 }
 0x1cb   : > { %v691_v8 = vmax.f32 %v629_v7, 0.0  ;;  %v1133_v9 = vpop.f32.mrb[6].mxu1 }
 0x1cc   : > { %v644_v11 = vadd.f32 %v1133_v9, %v970_v55  ;;  %v638_v12 = vpop.f32.mrb[7].mxu1 }
 0x1cd   : > { %v639_v13 = vadd.f32 %v970_v55, %v638_v12  ;;  %1184 = vmatprep.mubr.f32.mxu0 %v691_v8 }
 0x1ce   : > { %1185 = vmatmul.mubr.f32.gmra.mrb[20].mxu0 %v692_v10  ;;  %v694_v16 = vmax.f32 %v644_v11, 0.0 }
 0x1cf   : > { %v693_v14 = vmax.f32 %v639_v13, 0.0  ;;  %v1136_v15 = vpop.f32.mrb[8].mxu1 }
 0x1d0   : > { %v654_v17 = vadd.f32 %v1136_v15, %v970_v55  ;;  %v648_v18 = vpop.f32.mrb[9].mxu1 }
 0x1d1   : > { %v649_v19 = vadd.f32 %v970_v55, %v648_v18  ;;  %1187 = vmatprep.mubr.f32.mxu0 %v693_v14 }
 0x1d2   : > { %1188 = vmatmul.mubr.f32.gmra.mrb[22].mxu0 %v694_v16  ;;  %v696_v22 = vmax.f32 %v654_v17, 0.0 }
 0x1d3   : > { %v695_v20 = vmax.f32 %v649_v19, 0.0  ;;  %v1139_v21 = vpop.f32.mrb[10].mxu1 }
 0x1d4   : > { %v664_v23 = vadd.f32 %v1139_v21, %v970_v55  ;;  %v658_v24 = vpop.f32.mrb[11].mxu1 }
 0x1d5   : > { %v659_v25 = vadd.f32 %v970_v55, %v658_v24  ;;  %1190 = vmatprep.mubr.f32.mxu0 %v695_v20 }
 0x1d6   : > { %1191 = vmatmul.mubr.f32.gmra.mrb[24].mxu0 %v696_v22  ;;  %v698_v28 = vmax.f32 %v664_v23, 0.0 }
 0x1d7   : > { %v697_v26 = vmax.f32 %v659_v25, 0.0  ;;  %v1142_v27 = vpop.f32.mrb[12].mxu1 }
 0x1d8   : > { %v674_v29 = vadd.f32 %v1142_v27, %v970_v55  ;;  %v668_v30 = vpop.f32.mrb[13].mxu1 }
 0x1d9   : > { %v669_v31 = vadd.f32 %v970_v55, %v668_v30  ;;  %1193 = vmatprep.mubr.f32.mxu0 %v697_v26 }
 0x1da   : > { %1194 = vmatmul.mubr.f32.gmra.mrb[26].mxu0 %v698_v28  ;;  %v700_v34 = vmax.f32 %v674_v29, 0.0 }
 0x1db   : > { %v699_v32 = vmax.f32 %v669_v31, 0.0  ;;  %v1145_v33 = vpop.f32.mrb[14].mxu1 }
 0x1dc   : > { %v684_v35 = vadd.f32 %v1145_v33, %v970_v55  ;;  %v678_v36 = vpop.f32.mrb[15].mxu1 }
 0x1dd   : > { %v679_v37 = vadd.f32 %v970_v55, %v678_v36  ;;  %1196 = vmatprep.mubr.f32.mxu0 %v699_v32 }
 0x1de   : > { %1197 = vmatmul.mubr.f32.gmra.mrb[28].mxu0 %v700_v34  ;;  %v702_v39 = vmax.f32 %v684_v35, 0.0 }
 0x1df   : > { %v701_v38 = vmax.f32 %v679_v37, 0.0 }
 0x1e1   : > { %1199 = vmatprep.mubr.f32.mxu1 %v701_v38 }
 0x1e2   : > { %1200 = vmatmul.mubr.f32.vlgmr.msra.gmra.mrb[16].mxu1 %v702_v39 }
 0x299   : > { %v1180_v41 = vpop.f32.mrb[16].mxu0 }
 0x29a   : > { %v798_v42 = vadd.f32 %v1180_v41, %v971_v40  ;;  %v792_v43 = vpop.f32.mrb[17].mxu0 }
 0x29b   : > { %v793_v44 = vadd.f32 %v971_v40, %v792_v43 }
 0x29c   : > { %873 = vst.msk [vmem:[%s1560_s30 + $0x8] sm:$0xff] %vm871_vm1, %v798_v42 }
 0x29d   : > { %872 = vst.msk [vmem:[%s1560_s30] sm:$0xff] %vm871_vm1, %v793_v44  ;;  %v1183_v45 = vpop.f32.mrb[18].mxu0 }
 0x29e   : > { %v808_v46 = vadd.f32 %v1183_v45, %v971_v40  ;;  %v802_v47 = vpop.f32.mrb[19].mxu0 }
 0x29f   : > { %v803_v48 = vadd.f32 %v971_v40, %v802_v47 }
 0x2a0   : > { %875 = vst.msk [vmem:[%s1560_s30 + $0x18] sm:$0xff] %vm871_vm1, %v808_v46 }
 0x2a1   : > { %874 = vst.msk [vmem:[%s1560_s30 + $0x10] sm:$0xff] %vm871_vm1, %v803_v48  ;;  %v1186_v49 = vpop.f32.mrb[20].mxu0 }
 0x2a2   : > { %v818_v50 = vadd.f32 %v1186_v49, %v971_v40  ;;  %v812_v51 = vpop.f32.mrb[21].mxu0 }
 0x2a3   : > { %v813_v52 = vadd.f32 %v971_v40, %v812_v51 }
 0x2a4   : > { %877 = vst.msk [vmem:[%s1560_s30 + $0x28] sm:$0xff] %vm871_vm1, %v818_v50 }
 0x2a5   : > { %876 = vst.msk [vmem:[%s1560_s30 + $0x20] sm:$0xff] %vm871_vm1, %v813_v52  ;;  %v1189_v53 = vpop.f32.mrb[22].mxu0 }
 0x2a6   : > { %v828_v54 = vadd.f32 %v1189_v53, %v971_v40  ;;  %v822_v55 = vpop.f32.mrb[23].mxu0 }
 0x2a7   : > { %v823_v56 = vadd.f32 %v971_v40, %v822_v55 }
 0x2a8   : > { %879 = vst.msk [vmem:[%s1560_s30 + $0x38] sm:$0xff] %vm871_vm1, %v828_v54 }
 0x2a9   : > { %878 = vst.msk [vmem:[%s1560_s30 + $0x30] sm:$0xff] %vm871_vm1, %v823_v56  ;;  %v1192_v57 = vpop.f32.mrb[24].mxu0 }
 0x2aa   : > { %v838_v58 = vadd.f32 %v1192_v57, %v971_v40  ;;  %v832_v59 = vpop.f32.mrb[25].mxu0 }
 0x2ab   : > { %v833_v60 = vadd.f32 %v971_v40, %v832_v59 }
 0x2ac   : > { %881 = vst.msk [vmem:[%s1560_s30 + $0x48] sm:$0xff] %vm871_vm1, %v838_v58 }
 0x2ad   : > { %880 = vst.msk [vmem:[%s1560_s30 + $0x40] sm:$0xff] %vm871_vm1, %v833_v60  ;;  %v1195_v61 = vpop.f32.mrb[26].mxu0 }
 0x2ae   : > { %v848_v62 = vadd.f32 %v1195_v61, %v971_v40  ;;  %v842_v63 = vpop.f32.mrb[27].mxu0 }
 0x2af   : > { %v843_v0 = vadd.f32 %v971_v40, %v842_v63 }
 0x2b0   : > { %883 = vst.msk [vmem:[%s1560_s30 + $0x58] sm:$0xff] %vm871_vm1, %v848_v62 }
 0x2b1   : > { %882 = vst.msk [vmem:[%s1560_s30 + $0x50] sm:$0xff] %vm871_vm1, %v843_v0  ;;  %v1198_v1 = vpop.f32.mrb[28].mxu0 }
 0x2b2   : > { %v858_v2 = vadd.f32 %v1198_v1, %v971_v40  ;;  %v852_v3 = vpop.f32.mrb[29].mxu0 }
 0x2b3   : > { %v853_v4 = vadd.f32 %v971_v40, %v852_v3 }
 0x2b4   : > { %885 = vst.msk [vmem:[%s1560_s30 + $0x68] sm:$0xff] %vm871_vm1, %v858_v2 }
 0x2b5   : > { %884 = vst.msk [vmem:[%s1560_s30 + $0x60] sm:$0xff] %vm871_vm1, %v853_v4  ;;  %v1201_v5 = vpop.f32.mrb[16].mxu1 }
 0x2b6   : > { %v868_v6 = vadd.f32 %v1201_v5, %v971_v40  ;;  %v862_v7 = vpop.f32.mrb[17].mxu1 }
 0x2b7   : > { %v863_v8 = vadd.f32 %v971_v40, %v862_v7 }
 0x2b8   : > { %887 = vst.msk [vmem:[%s1560_s30 + $0x78] sm:$0xff] %vm871_vm1, %v868_v6 }
 0x2b9   : > { %886 = vst.msk [vmem:[%s1560_s30 + $0x70] sm:$0xff] %vm871_vm1, %v863_v8 }
 0x2ba PF: > { %s17_s24 = sadd.s32 1, %s1304_s24  }
 0x2bb   : > { %p14_p4 = scmp.ge.s32.totalorder %s17_s24, 4  }
 0x2bd   :  { %16 = sbr.rel (!%p14_p4) target bundleno = 1 (0x1), region = 78 }

</bundles_post_ra>
